<compile_context>
chip_gen: v7x
topology: tpu7x:2x2x1
jax: 0.10.0
libtpu: 0.0.40
codegen_flags: <defaults>
</compile_context>

<pallas_src>
import functools
import math

import jax
import jax.numpy as jnp
from jax import lax
from jax.experimental import pallas as pl
from jax.experimental.pallas import tpu as pltpu


def _flash_attn_kernel(q_ref, k_ref, v_ref, o_ref, m_sc, l_sc, acc_sc,
                       *, q_blk, kv_blk, scale):
    """One (batch, head, q-block, kv-block) grid step of causal flash attention.

    q_ref : (q_blk, Dh)   query tile for this (b, h, qi)
    k_ref : (kv_blk, Dh)  key tile for this (b, h, ki)
    v_ref : (kv_blk, Dh)  value tile
    o_ref : (q_blk, Dh)   output tile (resident across the kv axis)
    m_sc / l_sc / acc_sc : online-softmax running max / sum / accumulator.
    """
    qi = pl.program_id(2)
    ki = pl.program_id(3)

    @pl.when(ki == 0)
    def _init():
        m_sc[...] = jnp.full_like(m_sc, -jnp.inf)
        l_sc[...] = jnp.zeros_like(l_sc)
        acc_sc[...] = jnp.zeros_like(acc_sc)

    q_start = qi * q_blk
    k_start = ki * kv_blk

    # Skip kv tiles that lie entirely above the causal diagonal
    # (no unmasked entries -> no contribution to m/l/acc).
    @pl.when(k_start <= q_start + (q_blk - 1))
    def _compute():
        q = q_ref[...]                     # (q_blk, Dh)
        k = k_ref[...]                     # (kv_blk, Dh)
        v = v_ref[...]                     # (kv_blk, Dh)

        # q @ k^T on the MXU, f32 accumulation, then scale (scale_attn_weights).
        s = lax.dot_general(q, k, (((1,), (1,)), ((), ())),
                            preferred_element_type=jnp.float32) * scale

        # Per-tile causal mask from global row/col offsets (no T x T iota).
        row = q_start + lax.broadcasted_iota(jnp.int32, (q_blk, kv_blk), 0)
        col = k_start + lax.broadcasted_iota(jnp.int32, (q_blk, kv_blk), 1)
        s = jnp.where(row >= col, s, jnp.finfo(jnp.float32).min)

        # Online softmax update (f32 statistics).
        m_prev = m_sc[...]
        m_new = jnp.maximum(m_prev, jnp.max(s, axis=-1, keepdims=True))
        alpha = jnp.exp(m_prev - m_new)
        p = jnp.exp(s - m_new)
        l_sc[...] = alpha * l_sc[...] + jnp.sum(p, axis=-1, keepdims=True)
        acc_sc[...] = alpha * acc_sc[...] + jnp.dot(
            p.astype(v.dtype), v, preferred_element_type=jnp.float32)
        m_sc[...] = m_new

    @pl.when(ki == pl.num_programs(3) - 1)
    def _finalize():
        inv_l = pl.reciprocal(l_sc[...], approx=True)   # EUP, not VALU
        o_ref[...] = (acc_sc[...] * inv_l).astype(o_ref.dtype)


def _flash_attention(q, k, v, *, q_block=128, kv_block=128,
                     vmem_limit_bytes=32 * 1024 * 1024):
    """Causal multi-head attention. q, k, v: (B, H, T, Dh) (lane-aligned per head)."""
    B, H, T, Dh = q.shape
    q_blk = min(q_block, T)
    kv_blk = min(kv_block, T)
    if T % q_blk or T % kv_blk:
        raise ValueError("sequence length must be a multiple of the block size")
    nq, nk = T // q_blk, T // kv_blk
    scale = 1.0 / math.sqrt(Dh)

    kernel = functools.partial(_flash_attn_kernel,
                               q_blk=q_blk, kv_blk=kv_blk, scale=scale)

    return pl.pallas_call(
        kernel,
        out_shape=jax.ShapeDtypeStruct((B, H, T, Dh), q.dtype),
        grid_spec=pltpu.PrefetchScalarGridSpec(
            num_scalar_prefetch=0,
            grid=(B, H, nq, nk),
            in_specs=[
                pl.BlockSpec((None, None, q_blk, Dh),
                             lambda b, h, qi, ki: (b, h, qi, 0)),   # Q
                pl.BlockSpec((None, None, kv_blk, Dh),
                             lambda b, h, qi, ki: (b, h, ki, 0)),   # K
                pl.BlockSpec((None, None, kv_blk, Dh),
                             lambda b, h, qi, ki: (b, h, ki, 0)),   # V
            ],
            out_specs=pl.BlockSpec((None, None, q_blk, Dh),
                                   lambda b, h, qi, ki: (b, h, qi, 0)),
            scratch_shapes=[
                pltpu.VMEM((q_blk, 1), jnp.float32),    # running max  m
                pltpu.VMEM((q_blk, 1), jnp.float32),    # running sum  l
                pltpu.VMEM((q_blk, Dh), jnp.float32),   # output accumulator
            ],
        ),
        compiler_params=pltpu.CompilerParams(
            dimension_semantics=("parallel", "parallel", "parallel", "arbitrary"),
            vmem_limit_bytes=vmem_limit_bytes,
        ),
    )(q, k, v)


def gpt2_attention_pallas(hidden_states, wc, bc, wp, bp, num_heads,
                          *, q_block=128, kv_block=128, attn_dtype=None):
    """Forward pass of DecisionTransformerGPT2Attention (self-attn, eval mode).

    hidden_states: (B, T, E); wc: (E, 3E); bc: (3E,); wp: (E, E); bp: (E,).
    attn_dtype: optional dtype (e.g. jnp.bfloat16) for the attention matmuls
                on v6e/v7x; softmax stats / accumulation stay f32.
    """
    B, T, E = hidden_states.shape
    head_dim = E // num_heads

    # c_attn: GPT-2 Conv1D == dense matmul. Left to XLA (optimal MXU matmul);
    # fusing it into the Pallas kernel would serialize it with the attention.
    qkv = jnp.einsum('bte,ef->btf', hidden_states, wc) + bc          # (B, T, 3E)
    q, k, v = jnp.split(qkv, 3, axis=-1)

    def split_heads(t):                                              # (B, H, T, Dh)
        return t.reshape(B, T, num_heads, head_dim).transpose(0, 2, 1, 3)

    q, k, v = split_heads(q), split_heads(k), split_heads(v)
    if attn_dtype is not None:
        q, k, v = (t.astype(attn_dtype) for t in (q, k, v))

    attn = _flash_attention(q, k, v, q_block=q_block, kv_block=kv_block)

    # _merge_heads + c_proj (dense matmul, XLA).
    merged = attn.astype(hidden_states.dtype).transpose(0, 2, 1, 3).reshape(B, T, E)
    out = jnp.einsum('bte,ef->btf', merged, wp) + bp
    # TODO(synk): attn_pdrop / resid_pdrop dropout are identity in eval mode;
    # cross-attention (q_attn), layer_past KV cache, and output_attentions are
    # not implemented (flash kernel never materializes the attention matrix).
    return out


def gpt2_attention_ref(hidden_states, wc, bc, wp, bp, num_heads):
    """Pure-JAX reference mirroring the PyTorch/MindSpore forward."""
    B, T, E = hidden_states.shape
    head_dim = E // num_heads
    qkv = jnp.einsum('bte,ef->btf', hidden_states, wc) + bc
    q, k, v = jnp.split(qkv, 3, axis=-1)

    def split_heads(t):
        return t.reshape(B, T, num_heads, head_dim).transpose(0, 2, 1, 3)

    q, k, v = split_heads(q), split_heads(k), split_heads(v)
    attn = jnp.einsum('bhqd,bhkd->bhqk', q, k) / (head_dim ** 0.5)
    causal = jnp.tril(jnp.ones((T, T), dtype=bool))[None, None]
    attn = jnp.where(causal, attn, jnp.finfo(jnp.float32).min)
    attn = jax.nn.softmax(attn, axis=-1)
    out = jnp.einsum('bhqk,bhkd->bhqd', attn, v)
    out = out.transpose(0, 2, 1, 3).reshape(B, T, E)
    out = jnp.einsum('bte,ef->btf', out, wp) + bp
    return out


def _make_inputs(key, B, T, E):
    k1, k2, k3, k4, k5 = jax.random.split(key, 5)
    hidden_states = jax.random.normal(k1, (B, T, E), dtype=jnp.float32)
    # Conv1D params (GPT2 style: weight is (in, out), bias (out,))
    wc = jax.random.normal(k2, (E, 3 * E), dtype=jnp.float32) * 0.02
    bc = jax.random.normal(k3, (3 * E,), dtype=jnp.float32) * 0.02
    wp = jax.random.normal(k4, (E, E), dtype=jnp.float32) * 0.02
    bp = jax.random.normal(k5, (E,), dtype=jnp.float32) * 0.02
    return hidden_states, wc, bc, wp, bp


if __name__ == "__main__":
    key = jax.random.PRNGKey(0)
    key1, key2 = jax.random.split(key)

    # Test 1: small config consistent with the module (hidden=32, heads=4, seq=8, batch=2).
    B, T, E, H = 2, 8, 32, 4
    x, wc, bc, wp, bp = _make_inputs(key1, B, T, E)
    out = gpt2_attention_pallas(x, wc, bc, wp, bp, H)
    out = jax.block_until_ready(out)
    ref = gpt2_attention_ref(x, wc, bc, wp, bp, H)
    assert out.shape == (B, T, E)
    assert jnp.allclose(out, ref, atol=2e-3, rtol=2e-3), "mismatch vs reference (small)"

    # Test 2: exercises multi-block tiling, online softmax across kv blocks,
    # and the above-diagonal tile-skip path (T=256 -> 2x2 q/kv blocks of 128).
    B2, T2, E2, H2 = 2, 256, 128, 2
    x2, wc2, bc2, wp2, bp2 = _make_inputs(key2, B2, T2, E2)
    out2 = gpt2_attention_pallas(x2, wc2, bc2, wp2, bp2, H2)
    out2 = jax.block_until_ready(out2)
    ref2 = gpt2_attention_ref(x2, wc2, bc2, wp2, bp2, H2)
    assert out2.shape == (B2, T2, E2)
    assert jnp.allclose(out2, ref2, atol=2e-3, rtol=2e-3), "mismatch vs reference (tiled)"

    print("KERNEL_OK")
</pallas_src>

<mosaic_0001>
module attributes {stable_mosaic.version = 11 : i64} {
  func.func @_flash_attn_kernel(%arg0: i32, %arg1: i32, %arg2: i32, %arg3: i32, %arg4: memref<1x1x8x8xf32, #tpu.memory_space<vmem>>, %arg5: memref<1x1x8x8xf32, #tpu.memory_space<vmem>>, %arg6: memref<1x1x8x8xf32, #tpu.memory_space<vmem>>, %arg7: memref<1x1x8x8xf32, #tpu.memory_space<vmem>>, %arg8: memref<8x1xf32, #tpu.memory_space<vmem>>, %arg9: memref<8x1xf32, #tpu.memory_space<vmem>>, %arg10: memref<8x8xf32, #tpu.memory_space<vmem>>) attributes {dimension_semantics = [#tpu.dimension_semantics<parallel>, #tpu.dimension_semantics<parallel>, #tpu.dimension_semantics<parallel>, #tpu.dimension_semantics<arbitrary>], iteration_bounds = array<i64: 2, 4, 1, 1>, scalar_prefetch = 0 : i64, scratch_operands = 3 : i64, tpu.core_type = #tpu.core_type<tc>, window_params = [{transform_indices = @transform_0, window_bounds = array<i64: 1, 1, 8, 8>}, {transform_indices = @transform_1, window_bounds = array<i64: 1, 1, 8, 8>}, {transform_indices = @transform_2, window_bounds = array<i64: 1, 1, 8, 8>}, {transform_indices = @transform_3, window_bounds = array<i64: 1, 1, 8, 8>}]} {
    %c0_i32 = arith.constant 0 : i32
    %0 = arith.cmpi eq, %arg3, %c0_i32 : i32
    %1 = arith.extui %0 : i1 to i32
    %c0_i32_0 = arith.constant 0 : i32
    %2 = arith.cmpi ne, %1, %c0_i32_0 : i32
    scf.if %2 {
      %cst = arith.constant 0xFF800000 : f32
      %12 = vector.broadcast %cst : f32 to vector<8x1xf32>
      %c0 = arith.constant 0 : index
      %c0_5 = arith.constant 0 : index
      %13 = vector.load %arg8[%c0, %c0_5] : memref<8x1xf32, #tpu.memory_space<vmem>>, vector<8x1xf32>
      tpu.vector_store %arg8[%c0, %c0_5], %12 {strides = array<i32>} : memref<8x1xf32, #tpu.memory_space<vmem>>, vector<8x1xf32>,
      %cst_6 = arith.constant 0.000000e+00 : f32
      %14 = vector.broadcast %cst_6 : f32 to vector<8x1xf32>
      %c0_7 = arith.constant 0 : index
      %c0_8 = arith.constant 0 : index
      %15 = vector.load %arg9[%c0_7, %c0_8] : memref<8x1xf32, #tpu.memory_space<vmem>>, vector<8x1xf32>
      tpu.vector_store %arg9[%c0_7, %c0_8], %14 {strides = array<i32>} : memref<8x1xf32, #tpu.memory_space<vmem>>, vector<8x1xf32>,
      %cst_9 = arith.constant 0.000000e+00 : f32
      %16 = vector.broadcast %cst_9 : f32 to vector<8x8xf32>
      %c0_10 = arith.constant 0 : index
      %c0_11 = arith.constant 0 : index
      %17 = vector.load %arg10[%c0_10, %c0_11] : memref<8x8xf32, #tpu.memory_space<vmem>>, vector<8x8xf32>
      tpu.vector_store %arg10[%c0_10, %c0_11], %16 {strides = array<i32>} : memref<8x8xf32, #tpu.memory_space<vmem>>, vector<8x8xf32>,
    } else {
    }
    %c8_i32 = arith.constant 8 : i32
    %3 = arith.muli %arg2, %c8_i32 : i32
    %c8_i32_1 = arith.constant 8 : i32
    %4 = arith.muli %arg3, %c8_i32_1 : i32
    %c7_i32 = arith.constant 7 : i32
    %5 = arith.addi %3, %c7_i32 : i32
    %6 = arith.cmpi sle, %4, %5 : i32
    %7 = arith.extui %6 : i1 to i32
    %c0_i32_2 = arith.constant 0 : i32
    %8 = arith.cmpi ne, %7, %c0_i32_2 : i32
    scf.if %8 {
      %c0 = arith.constant 0 : index
      %c0_5 = arith.constant 0 : index
      %c0_6 = arith.constant 0 : index
      %c0_7 = arith.constant 0 : index
      %12 = vector.load %arg4[%c0, %c0_5, %c0_6, %c0_7] : memref<1x1x8x8xf32, #tpu.memory_space<vmem>>, vector<1x1x8x8xf32>
      %13 = vector.shape_cast %12 : vector<1x1x8x8xf32> to vector<8x8xf32>
      %c0_8 = arith.constant 0 : index
      %c0_9 = arith.constant 0 : index
      %c0_10 = arith.constant 0 : index
      %c0_11 = arith.constant 0 : index
      %14 = vector.load %arg5[%c0_8, %c0_9, %c0_10, %c0_11] : memref<1x1x8x8xf32, #tpu.memory_space<vmem>>, vector<1x1x8x8xf32>
      %15 = vector.shape_cast %14 : vector<1x1x8x8xf32> to vector<8x8xf32>
      %c0_12 = arith.constant 0 : index
      %c0_13 = arith.constant 0 : index
      %c0_14 = arith.constant 0 : index
      %c0_15 = arith.constant 0 : index
      %16 = vector.load %arg6[%c0_12, %c0_13, %c0_14, %c0_15] : memref<1x1x8x8xf32, #tpu.memory_space<vmem>>, vector<1x1x8x8xf32>
      %17 = vector.shape_cast %16 : vector<1x1x8x8xf32> to vector<8x8xf32>
      %cst = arith.constant dense<0.000000e+00> : vector<8x8xf32>
      %18 = tpu.matmul %13, %15, %cst {dimension_numbers = #tpu.dot_dimension_numbers<[1], [1], [0], [0], [0, 0, 1, 0], [], []>} : vector<8x8xf32>, vector<8x8xf32>, vector<8x8xf32> -> vector<8x8xf32>
      %cst_16 = arith.constant 0.353553385 : f32
      %19 = vector.broadcast %cst_16 : f32 to vector<8x8xf32>
      %20 = arith.mulf %18, %19 : vector<8x8xf32>
      %21 = tpu.iota {dimensions = array<i32: 0>} : vector<8x8xi32>
      %22 = vector.broadcast %3 : i32 to vector<8x8xi32>
      %23 = arith.addi %22, %21 : vector<8x8xi32>
      %24 = tpu.iota {dimensions = array<i32: 1>} : vector<8x8xi32>
      %25 = vector.broadcast %4 : i32 to vector<8x8xi32>
      %26 = arith.addi %25, %24 : vector<8x8xi32>
      %27 = arith.cmpi sge, %23, %26 : vector<8x8xi32>
      %cst_17 = arith.constant -3.40282347E+38 : f32
      %28 = vector.broadcast %cst_17 : f32 to vector<8x8xf32>
      %29 = arith.select %27, %20, %28 : vector<8x8xi1>, vector<8x8xf32>
      %c0_18 = arith.constant 0 : index
      %c0_19 = arith.constant 0 : index
      %30 = vector.load %arg8[%c0_18, %c0_19] : memref<8x1xf32, #tpu.memory_space<vmem>>, vector<8x1xf32>
      %cst_20 = arith.constant dense<0xFF800000> : vector<8xf32>
      %31 = vector.multi_reduction <maximumf>, %29, %cst_20 [1] : vector<8x8xf32> to vector<8xf32>
      %32 = vector.shape_cast %31 : vector<8xf32> to vector<8x1xf32>
      %33 = arith.maximumf %30, %32 : vector<8x1xf32>
      %34 = arith.subf %30, %33 : vector<8x1xf32>
      %35 = math.exp %34 : vector<8x1xf32>
      %36 = vector.broadcast %33 : vector<8x1xf32> to vector<8x8xf32>
      %37 = arith.subf %29, %36 : vector<8x8xf32>
      %38 = math.exp %37 : vector<8x8xf32>
      %c0_21 = arith.constant 0 : index
      %c0_22 = arith.constant 0 : index
      %39 = vector.load %arg9[%c0_21, %c0_22] : memref<8x1xf32, #tpu.memory_space<vmem>>, vector<8x1xf32>
      %40 = arith.mulf %35, %39 : vector<8x1xf32>
      %cst_23 = arith.constant dense<0.000000e+00> : vector<8xf32>
      %41 = vector.multi_reduction <add>, %38, %cst_23 [1] : vector<8x8xf32> to vector<8xf32>
      %42 = vector.shape_cast %41 : vector<8xf32> to vector<8x1xf32>
      %43 = arith.addf %40, %42 : vector<8x1xf32>
      %c0_24 = arith.constant 0 : index
      %c0_25 = arith.constant 0 : index
      %44 = vector.load %arg9[%c0_24, %c0_25] : memref<8x1xf32, #tpu.memory_space<vmem>>, vector<8x1xf32>
      tpu.vector_store %arg9[%c0_24, %c0_25], %43 {strides = array<i32>} : memref<8x1xf32, #tpu.memory_space<vmem>>, vector<8x1xf32>,
      %c0_26 = arith.constant 0 : index
      %c0_27 = arith.constant 0 : index
      %45 = vector.load %arg10[%c0_26, %c0_27] : memref<8x8xf32, #tpu.memory_space<vmem>>, vector<8x8xf32>
      %46 = vector.broadcast %35 : vector<8x1xf32> to vector<8x8xf32>
      %47 = arith.mulf %46, %45 : vector<8x8xf32>
      %cst_28 = arith.constant dense<0.000000e+00> : vector<8x8xf32>
      %48 = tpu.matmul %38, %17, %cst_28 {dimension_numbers = #tpu.dot_dimension_numbers<[1], [0], [0], [1], [0, 0, 1, 1], [], []>} : vector<8x8xf32>, vector<8x8xf32>, vector<8x8xf32> -> vector<8x8xf32>
      %49 = arith.addf %47, %48 : vector<8x8xf32>
      %c0_29 = arith.constant 0 : index
      %c0_30 = arith.constant 0 : index
      %50 = vector.load %arg10[%c0_29, %c0_30] : memref<8x8xf32, #tpu.memory_space<vmem>>, vector<8x8xf32>
      tpu.vector_store %arg10[%c0_29, %c0_30], %49 {strides = array<i32>} : memref<8x8xf32, #tpu.memory_space<vmem>>, vector<8x8xf32>,
      %c0_31 = arith.constant 0 : index
      %c0_32 = arith.constant 0 : index
      %51 = vector.load %arg8[%c0_31, %c0_32] : memref<8x1xf32, #tpu.memory_space<vmem>>, vector<8x1xf32>
      tpu.vector_store %arg8[%c0_31, %c0_32], %33 {strides = array<i32>} : memref<8x1xf32, #tpu.memory_space<vmem>>, vector<8x1xf32>,
    } else {
    }
    %c0_i32_3 = arith.constant 0 : i32
    %9 = arith.cmpi eq, %arg3, %c0_i32_3 : i32
    %10 = arith.extui %9 : i1 to i32
    %c0_i32_4 = arith.constant 0 : i32
    %11 = arith.cmpi ne, %10, %c0_i32_4 : i32
    scf.if %11 {
      %c0 = arith.constant 0 : index
      %c0_5 = arith.constant 0 : index
      %12 = vector.load %arg9[%c0, %c0_5] : memref<8x1xf32, #tpu.memory_space<vmem>>, vector<8x1xf32>
      %13 = tpu.reciprocal %12 {approx = true} : vector<8x1xf32> -> vector<8x1xf32>
      %c0_6 = arith.constant 0 : index
      %c0_7 = arith.constant 0 : index
      %14 = vector.load %arg10[%c0_6, %c0_7] : memref<8x8xf32, #tpu.memory_space<vmem>>, vector<8x8xf32>
      %15 = vector.broadcast %13 : vector<8x1xf32> to vector<8x8xf32>
      %16 = arith.mulf %14, %15 : vector<8x8xf32>
      %c0_8 = arith.constant 0 : index
      %c0_9 = arith.constant 0 : index
      %c0_10 = arith.constant 0 : index
      %c0_11 = arith.constant 0 : index
      %17 = vector.load %arg7[%c0_8, %c0_9, %c0_10, %c0_11] : memref<1x1x8x8xf32, #tpu.memory_space<vmem>>, vector<1x1x8x8xf32>
      %18 = vector.shape_cast %17 : vector<1x1x8x8xf32> to vector<8x8xf32>
      %19 = vector.shape_cast %16 : vector<8x8xf32> to vector<1x1x8x8xf32>
      tpu.vector_store %arg7[%c0_8, %c0_9, %c0_10, %c0_11], %19 {strides = array<i32>} : memref<1x1x8x8xf32, #tpu.memory_space<vmem>>, vector<1x1x8x8xf32>,
    } else {
    }
    return
  }
  func.func @transform_0(%arg0: i32, %arg1: i32, %arg2: i32, %arg3: i32) -> (i32, i32, i32, i32) {
    %c0_i32 = arith.constant 0 : i32
    %c0_i32_0 = arith.constant 0 : i32
    return %arg0, %arg1, %arg2, %c0_i32 : i32, i32, i32, i32
  }
  func.func @transform_1(%arg0: i32, %arg1: i32, %arg2: i32, %arg3: i32) -> (i32, i32, i32, i32) {
    %c0_i32 = arith.constant 0 : i32
    %c0_i32_0 = arith.constant 0 : i32
    return %arg0, %arg1, %arg3, %c0_i32 : i32, i32, i32, i32
  }
  func.func @transform_2(%arg0: i32, %arg1: i32, %arg2: i32, %arg3: i32) -> (i32, i32, i32, i32) {
    %c0_i32 = arith.constant 0 : i32
    %c0_i32_0 = arith.constant 0 : i32
    return %arg0, %arg1, %arg3, %c0_i32 : i32, i32, i32, i32
  }
  func.func @transform_3(%arg0: i32, %arg1: i32, %arg2: i32, %arg3: i32) -> (i32, i32, i32, i32) {
    %c0_i32 = arith.constant 0 : i32
    %c0_i32_0 = arith.constant 0 : i32
    return %arg0, %arg1, %arg2, %c0_i32 : i32, i32, i32, i32
  }
}

</mosaic_0001>

<bundles_post_ra>
// kernel: tpu_custom_call.1
= control target key start
LH: loop header
LB: loop body
LE: loop exit
PB: predicated region body
PF: predicated region fallthrough
CT: control target
= control target key end

     0   :  { %s1355_s0 = inlined_call_operand.hbm [shape: f32[2,4,8,8], index: 0, kind: input, shape index: {}]   ;;  %s1356_s1 = inlined_call_operand.hbm [shape: f32[2,4,8,8], index: 1, kind: input, shape index: {}]   ;;  %s1357_s2 = inlined_call_operand.hbm [shape: f32[2,4,8,8], index: 2, kind: input, shape index: {}]   ;;  %s1358_s3 = inlined_call_operand.hbm [shape: f32[2,4,8,8], index: 3, kind: output, shape index: {}]  }
   0x1   :  { %1368 = sst [smem:[#allocation21_spill]] %s1356_s1 }
   0x2   :  { %8 = vsyncpa [#allocation6], 0 }
   0x3   :  { %10 = vsyncpa [#allocation6 + $0x1], 0 }
   0x4   :  { %11 = vsyncpa [#allocation9], 0 }
   0x5   :  { %13 = vsyncpa [#allocation9 + $0x1], 0 }
   0x6   :  { %14 = vsyncpa [#allocation7], 0 }
   0x7   :  { %16 = vsyncpa [#allocation7 + $0x1], 0  ;;  %s1057_s12 = smov 0   ;;  %s1059_s13 = smov 0  }
   0x8   :  { %s1061_s14 = smov 0   ;;  %s1063_s15 = smov 0  }
   0x9   :  { %s1065_s16 = smov 0   ;;  %s1067_s17 = smov 0  }
   0xa   :  { %s1069_s18 = smov 0   ;;  %s1071_s19 = smov 0  }
   0xb LB: > { %1369 = sst [smem:[#allocation15_spill]] %s1019_s17  ;;  %s1098_s20 = sadd.s32 4294967295, %s1027_s19   ;;  %s1027_s19 = sphi %s1071_s19, %s22_s19   ;;  %s1023_s18 = sphi %s1069_s18, %s1396_s18   ;;  %s1019_s17 = sphi %s1067_s17, %s1395_s17   ;;  %s1015_s16 = sphi %s1065_s16, %s1394_s16   ;;  %s1011_s15 = sphi %s1063_s15, %s1393_s15   ;;  %s1007_s14 = sphi %s1061_s14, %s1399_s14   ;;  %s1003_s13 = sphi %s1059_s13, %s1398_s13   ;;  %s999_s12 = sphi %s1057_s12, %s1397_s12  }
   0xc   : > { %1370 = sst [smem:[#allocation16_spill]] %s1023_s18  ;;  %s696_s21 = sadd.s32 4294967294, %s1027_s19  }
   0xd   : > { %s44_s22 = sadd.s32 1, %s1019_s17  ;;  %s48_s23 = sadd.s32 1, %s1023_s18 }
   0xe   : > { %p46_p0 = scmp.ge.s32.totalorder %s44_s22, 4  ;;  %s59_s24 = sadd.s32 1, %s1007_s14 }
   0xf   : > { %p66_p1 = scmp.ne.s32.totalorder %s1007_s14, %s1003_s13  ;;  %p67_p2 = scmp.eq.s32.totalorder %s1027_s19, 0 }
  0x10   : > { %s1401_s22 = smov (%p46_p0, %s44_s22), 0  ;;  %s1403_s23 = smov (!%p46_p0, %s48_s23), %s1023_s18 }
  0x11   : > { %1371 = sst [smem:[#allocation17_spill]] %s1401_s22  ;;  %s53_s25 = ssub.s32 %s1019_s17, %s1401_s22 }
  0x12   : > { %p1112_p3 = por %p67_p2, %p66_p1  ;;  %p50_p4 = scmp.ge.s32.totalorder %s1403_s23, 2 }
  0x13   : > { %p72_p5 = scmp.ne.s32.totalorder %s1003_s13, %s999_s12  ;;  %p73_p6 = scmp.eq.s32.totalorder %s1098_s20, 0 }
  0x14   : > { %p160_p7 = scmp.eq.s32.totalorder %s1098_s20, 7  ;;  %s1405_s23 = smov (%p50_p4, %s1403_s23), 0 }
  0x15   : > { %1373 = sst [smem:[#allocation18_spill]] %s1405_s23  ;;  %p1122_p8 = por %p73_p6, %p72_p5 }
  0x16   : > { %p1126_p9 = por %p160_p7, %p66_p1  ;;  %s52_s29 = ssub.s32 %s1023_s18, %s1405_s23 }
  0x17   : > { %s1374_s27 = scalar_select %p1122_p8, 1, 0 }
  0x18   : > { %s1375_s28 = scalar_select %p1126_p9, 1, 0 }
  0x19   : > { %p166_p10 = scmp.eq.s32.totalorder %s696_s21, 7  ;;  %s54_s30 = sor.u32 %s53_s25, %s52_s29 }
  0x1a   : > { %p57_p11 = scmp.eq.s32.totalorder %s54_s30, 0  ;;  %p757_p13 = scmp.lt.s32.totalorder %s1027_s19, 8 }
  0x1b   : > { %p1132_p12 = por %p166_p10, %p72_p5  ;;  %s1359_s5 = sand.u32 1, %s1007_s14  }
  0x1c   : > { %s1139_s6 = scalar_select %p57_p11, %s1007_s14, %s59_s24  }
  0x1d   : > { %s1376_s4 = scalar_select %p1132_p12, 1, 0 }
  0x1e   : > { %1378 = sst [smem:[#allocation20_spill]] %s1139_s6  ;;  %s1143_s7 = sshll.u32 %s1359_s5, 3 }
  0x1f   : > { %1377 = sst [smem:[#allocation19_spill]] %s1376_s4  ;;  %s700_s8 = sshll.u32 %s1023_s18, 2 }
  0x20   : > { %s196_s9 = sadd.s32 %s1019_s17, %s700_s8  ;;  %p1149_p0 = pnand %p757_p13, %p1112_p3 }
  0x21   : > { %s1153_s11 = sshll.u32 %s196_s9, 7  ;;  %s207_s21 = sand.u32 1, %s1027_s19  }
  0x22   : > { %s1379_s10 = scalar_select %p1149_p0, 1, 0 }
  0x23   : > { %s1380_s1 = sld [smem:[#allocation21_spill]]  ;;  %s211_s30 = scalar_lea.vmem [#allocation8], %s1143_s7 }
  0x24   : > { %s221_s26 = sshll.u32 %s211_s30, 4  ;;  %s1167_s8 = scalar_lea.sflag [#allocation9], %s207_s21  ;;  %s1164_s26 = int_to_ptr.vmem [resolvable:$true] %s221_s26 }
  0x25   : > { %p1173_p4 = pneg %p1149_p0 }
  0x29   : > { %s1160_s24 = scalar_lea.hbm %s1380_s1, %s1153_s11  ;;  %s840_s30 = scalar_lea.hbm %s1380_s1, 1024 }
  0x2a   : > { %s835_s9 = scalar_lea.hbm %s1160_s24, 128  ;;  %p841_p7 = scmp.lt.u32.totalorder %s1160_s24, %s1380_s1 }
  0x2b   : > { %p836_p3 = scmp.ne.s32.totalorder %s1160_s24, %s835_s9  ;;  %p842_p10 = scmp.lt.u32.totalorder %s840_s30, %s835_s9 }
  0x2c   : > { %p844_p13 = scmp.lt.u32.totalorder %s835_s9, %s1160_s24 }
  0x2d   : > { %p838_p5 = pnand %p1173_p4, %p836_p3  ;;  %p843_p11 = por %p842_p10, %p841_p7 }
  0x2f   : > { %p839_p6 = pneg %p838_p5  ;;  %p845_p1 = por %p844_p13, %p843_p11 }
  0x31   : > { %p846_p2 = pnand %p845_p1, %p839_p6 }
  0x33   : > { %849 = shalt.err (!%p846_p2)
}
  0x34   : > { %s850_s21 = scalar_lea.vmem %s1164_s26, 128  ;;  %s1029_s25 = smov [#allocation8]  }
  0x35   : > { %p851_p3 = scmp.ne.s32.totalorder %s1164_s26, %s850_s21  ;;  %s855_s29 = sshll.u32 %s1029_s25, 4  ;;  %s856_s29 = int_to_ptr.vmem [resolvable:$false] %s855_s29 }
  0x36   : > { %s857_s22 = scalar_lea.vmem %s856_s29, 256  ;;  %p858_p9 = scmp.lt.s32.totalorder %s1164_s26, %s856_s29 }
  0x37   : > { %p853_p5 = pnand %p851_p3, %p1173_p4  ;;  %p859_p8 = scmp.lt.s32.totalorder %s857_s22, %s850_s21 }
  0x39   : > { %p854_p12 = pneg %p853_p5  ;;  %p860_p7 = por %p859_p8, %p858_p9 }
  0x3b   : > { %p861_p10 = pnand %p860_p7, %p854_p12 }
  0x3d   : > { %864 = shalt.err (!%p861_p10)
}
  0x3e   : > { %749 = dma.hbm_to_vmem [thread:$0]  (!%p1149_p0), %s1160_s24, 128, %s1164_s26, %s1167_s8  }
  0x3f   : > { %p1382_p1 = scmp.lt.s32.totalorder %s1027_s19, 9  ;;  %p1383_p2 = scmp.ge.s32.totalorder %s1027_s19, 1 }
  0x40   : > { %s1209_s21 = scalar_lea.hbm %s1355_s0, %s1153_s11  ;;  %s190_s25 = scalar_lea.vmem [#allocation5], %s1143_s7 }
  0x41   : > { %p1201_p6 = pnand %p1383_p2, %p1382_p1  ;;  %s200_s29 = sshll.u32 %s190_s25, 4  ;;  %s1212_s29 = int_to_ptr.vmem [resolvable:$true] %s200_s29 }
  0x42   : > { %s1218_s22 = scalar_lea.hbm %s1357_s2, %s1153_s11  ;;  %s1385_s1 = sand.u32 1, %s1007_s14  }
  0x43   : > { %s1384_s23 = scalar_select %p1201_p6, 1, 0 }
  0x44   : > { %s187_s18 = scalar_lea.sflag [#allocation6], %s1385_s1  ;;  %s865_s17 = scalar_lea.hbm %s1209_s21, 128 }
  0x45   : > { %p866_p8 = scmp.ne.s32.totalorder %s1209_s21, %s865_s17  ;;  %s870_s6 = scalar_lea.hbm %s1355_s0, 1024 }
  0x46   : > { %p871_p11 = scmp.lt.u32.totalorder %s1209_s21, %s1355_s0  ;;  %p872_p13 = scmp.lt.u32.totalorder %s870_s6, %s865_s17 }
  0x47   : > { %p868_p9 = pnand %p866_p8, %p1173_p4  ;;  %p874_p5 = scmp.lt.u32.totalorder %s865_s17, %s1209_s21 }
  0x48   : > { %p873_p3 = por %p872_p13, %p871_p11 }
  0x49   : > { %p869_p12 = pneg %p868_p9 }
  0x4a   : > { %p875_p7 = por %p874_p5, %p873_p3 }
  0x4c   : > { %p876_p10 = pnand %p875_p7, %p869_p12 }
  0x4e   : > { %879 = shalt.err (!%p876_p10)
}
  0x4f   : > { %s880_s1 = scalar_lea.vmem %s1212_s29, 128  ;;  %s1030_s11 = smov [#allocation5]  }
  0x50   : > { %p881_p1 = scmp.ne.s32.totalorder %s1212_s29, %s880_s1  ;;  %s885_s24 = sshll.u32 %s1030_s11, 4  ;;  %s886_s24 = int_to_ptr.vmem [resolvable:$false] %s885_s24 }
  0x51   : > { %s887_s4 = scalar_lea.vmem %s886_s24, 256  ;;  %p888_p9 = scmp.lt.s32.totalorder %s1212_s29, %s886_s24 }
  0x52   : > { %p883_p2 = pnand %p881_p1, %p1173_p4  ;;  %p889_p6 = scmp.lt.s32.totalorder %s887_s4, %s880_s1 }
  0x54   : > { %p884_p8 = pneg %p883_p2  ;;  %p890_p11 = por %p889_p6, %p888_p9 }
  0x56   : > { %p891_p13 = pnand %p890_p11, %p884_p8 }
  0x58   : > { %894 = shalt.err (!%p891_p13)
}
  0x59   : > { %746 = dma.hbm_to_vmem [thread:$0]  (!%p1149_p0), %s1209_s21, 128, %s1212_s29, %s187_s18  }
  0x5a   : > { %s232_s17 = scalar_lea.vmem [#allocation10], %s1143_s7  ;;  %s895_s26 = scalar_lea.hbm %s1218_s22, 128 }
  0x5b   : > { %s242_s6 = sshll.u32 %s232_s17, 4  ;;  %p896_p12 = scmp.ne.s32.totalorder %s1218_s22, %s895_s26  ;;  %s243_s6 = int_to_ptr.vmem [resolvable:$true] %s242_s6 }
  0x5c   : > { %s900_s25 = scalar_lea.hbm %s1357_s2, 1024  ;;  %p901_p5 = scmp.lt.u32.totalorder %s1218_s22, %s1357_s2 }
  0x5d   : > { %p898_p6 = pnand %p896_p12, %p1173_p4  ;;  %p902_p7 = scmp.lt.u32.totalorder %s900_s25, %s895_s26 }
  0x5e   : > { %p904_p1 = scmp.lt.u32.totalorder %s895_s26, %s1218_s22 }
  0x5f   : > { %p899_p3 = pneg %p898_p6  ;;  %p903_p10 = por %p902_p7, %p901_p5 }
  0x61   : > { %p905_p2 = por %p904_p1, %p903_p10 }
  0x63   : > { %p906_p8 = pnand %p905_p2, %p899_p3 }
  0x65   : > { %909 = shalt.err (!%p906_p8)
}
  0x66   : > { %s910_s18 = scalar_lea.vmem %s243_s6, 128  ;;  %s1031_s7 = smov [#allocation10]  }
  0x67   : > { %p911_p9 = scmp.ne.s32.totalorder %s243_s6, %s910_s18  ;;  %s915_s21 = sshll.u32 %s1031_s7, 4  ;;  %s916_s21 = int_to_ptr.vmem [resolvable:$false] %s915_s21 }
  0x68   : > { %s917_s29 = scalar_lea.vmem %s916_s21, 256  ;;  %p918_p12 = scmp.lt.s32.totalorder %s243_s6, %s916_s21 }
  0x69   : > { %p913_p11 = pnand %p911_p9, %p1173_p4  ;;  %p919_p6 = scmp.lt.s32.totalorder %s917_s29, %s910_s18 }
  0x6b   : > { %p914_p13 = pneg %p913_p11  ;;  %p920_p0 = por %p919_p6, %p918_p12 }
  0x6d   : > { %p921_p5 = pnand %p920_p0, %p914_p13 }
  0x6f   : > { %924 = shalt.err (!%p921_p5)
}
  0x70   : > { %p1386_p7 = scmp.ne.s32.totalorder %s1379_s10, 0  ;;  %p1387_p3 = scmp.ne.s32.totalorder %s1384_s23, 0 }
  0x71   : > { %s1265_s5 = sand.u32 (!%p1387_p3), 1, %s1003_s13   ;;  %p1388_p0 = scmp.ne.s32.totalorder (!%p1387_p3), %s1374_s27, 0 }
  0x72   : > { %752 = dma.hbm_to_vmem [thread:$0]  (!%p1386_p7), %s1218_s22, 128, %s243_s6, %s1167_s8  }
  0x73   : > { %251 = sbr.rel (%p1387_p3) target bundleno = 943 (0x3af), region = 32  ;;  %s1268_s24 = sshll.u32 (!%p1387_p3), %s1265_s5, 3 }
  0x74   : > { %s254_s4 = scalar_lea.sflag (!%p1387_p3), [#allocation6], %s1265_s5  ;;  %s257_s17 = scalar_lea.vmem (!%p1387_p3), [#allocation5], %s1268_s24 }
  0x7a   : > { %986 = dma.done.wait (%p1388_p0), %s254_s4, 128  }
  0x7b   : > { %988 = vsyncadd (%p1388_p0), %s254_s4, 4294967168  ;;  %s262_s10 = sand.u32 1, %s1098_s20   ;;  %s266_s23 = scalar_lea.vmem [#allocation8], %s1268_s24 }
  0x7c   : > { %s263_s8 = scalar_lea.sflag [#allocation9], %s262_s10 }
  0x7d   : > { %990 = dma.done.wait (%p1388_p0), %s263_s8, 256  }
  0x7e   : > { %992 = vsyncadd (%p1388_p0), %s263_s8, 4294967040  ;;  %vm315_vm0 = vcmask 64512   ;;  %v1032_v0 = vmov 0.0   ;;  %vm1033_vm1 = vmmov 0   ;;  %v325_v1 = vld [vmem:[%s266_s23] sm:$0xff]  ;;  %v324_v2 = vld [vmem:[%s257_s17] sm:$0xff]  ;;  %v405_v4 = vlaneseq }
  0x7f   : > { %725 = vmatprep.subr.mxu0 %v1032_v0  ;;  %316 = vst.msk [vmem:[#allocation4] sm:$0xff] %vm315_vm0, %v1032_v0  ;;  %727 = vmatprep.mubr.msk.f32.mxu0 %vm1033_vm1, %v1032_v0  ;;  %vm312_vm2 = vcmask 7168   ;;  %v1034_v3 = vmov -inf   ;;  %v1035_v12 = vmov 0   ;;  %s275_s20 = scalar_lea.vmem [#allocation10], %s1268_s24  ;;  %s717_s27 = sshll.u32 %s1015_s16, 2 }
  0x80   : > { %730 = vmatprep.subr.mxu1 %v1032_v0  ;;  %732 = vmatprep.mubr.msk.f32.mxu1 %vm1033_vm1, %v1032_v0  ;;  %313 = vst.msk [vmem:[#allocation2] sm:$0xff] %vm312_vm2, %v1034_v3  ;;  %314 = vst.msk [vmem:[#allocation3] sm:$0xff] %vm312_vm2, %v1032_v0  ;;  %v406_v5 = vshrl.u32 %v405_v4, 7  ;;  %v410_v6 = vand.u32 127, %v405_v4  ;;  %v326_v17 = vld [vmem:[%s275_s20] sm:$0xff]  ;;  %s549_s22 = sadd.s32 %s1011_s15, %s717_s27  ;;  %s307_s26 = scalar_lea.vmem [#allocation11], %s1268_s24 }
  0x81   : > { %726 = vmatpush3.xpose.msk.msra.mxu0 %vm315_vm0, %v325_v1  ;;  %827 = vset.pattern.permute.xlu0 %v1035_v12  ;;  %s718_s6 = sshll.u32 %s549_s22, 7  ;;  %s553_s9 = sshll.u32 %s307_s26, 4  ;;  %s1302_s9 = int_to_ptr.vmem [resolvable:$true] %s553_s9 }
  0x82   : > { %vm413_vm3 = vcmp.ge.s32.totalorder %v406_v5, %v410_v6  ;;  %828 = vset.pattern.permute.xlu1 %v1035_v12  ;;  %731 = vmatpush3.msra.mxu1 %v326_v17  ;;  %s1300_s1 = scalar_lea.hbm %s1358_s3, %s718_s6  ;;  %s537_s16 = scalar_lea.sflag [#allocation7], %s1265_s5 }
  0x83   : > { %s925_s15 = scalar_lea.vmem %s1302_s9, 128  ;;  %p1389_p10 = scmp.ne.s32.totalorder %s1375_s28, 0 }
  0x84   : > { %728 = vmatmul.mubr.msk.f32.vlgmr.msra.gmra.mrb[0].mxu0 %vm315_vm0, %v324_v2  ;;  %p926_p4 = scmp.ne.s32.totalorder %s1302_s9, %s925_s15  ;;  %s1036_s11 = smov [#allocation11]  }
  0x85   : > { %s929_s18 = sshll.u32 %s1036_s11, 4  ;;  %s930_s18 = int_to_ptr.vmem [resolvable:$false] %s929_s18 }
  0x86   : > { %v439_v31 = vld [vmem:[#allocation4] sm:$0xff]  ;;  %p927_p1 = pnand %p926_p4, %p1389_p10  ;;  %s931_s7 = scalar_lea.vmem %s930_s18, 256 }
  0x87   : > { %v415_v13 = vld [vmem:[#allocation2] sm:$0xff]  ;;  %v431_v25 = vld [vmem:[#allocation3] sm:$0xff]  ;;  %p932_p8 = scmp.lt.s32.totalorder %s1302_s9, %s930_s18  ;;  %p933_p9 = scmp.lt.s32.totalorder %s931_s7, %s925_s15 }
  0x88   : > { %p928_p2 = pneg %p927_p1 }
  0x89   : > { %p934_p11 = por %p933_p9, %p932_p8 }
  0x8b   : > { %p935_p13 = pnand %p934_p11, %p928_p2 }
 0x157   : > { %v400_v7 = vpop.f32.mrb[0].mxu0 }
 0x158   : > { %v404_v8 = vmul.f32 0.35355338, %v400_v7  ;;  %v729_v9 = vpop.f32.mrb[1].mxu0 }
 0x15a   : > { %v414_v10 = vsel %vm413_vm3, %v404_v8, -3.4028235e+38 }
 0x15b   : > { %v416_v11 = vsel %vm315_vm0, %v414_v10, -inf }
 0x15c   : > { %417 = vmax.xlane.f32.xlu0 %v416_v11 }
 0x1e9   : > { %v418_v14 = vpop.xlane.xlu0 %417 }
 0x1ea   : > { %v419_v15 = vmax.f32 %v415_v13, %v418_v14 }
 0x1ec   : > { %v420_v16 = vsub.f32 %v415_v13, %v419_v15  ;;  %521 = vst.msk [vmem:[#allocation2] sm:$0xff] %vm312_vm2, %v419_v15  ;;  %425 = vperm.xlu0 %827, %v419_v15  }
 0x1ee   : > { %v421_v23 = vmul.f32 1.442695, %v420_v16 }
 0x26b   : > { %v426_v18 = vpop.permute.xlu0 %425 }
 0x26c   : > { %v428_v19 = vsub.f32 %v414_v10, %v426_v18 }
 0x26e   : > { %v429_v20 = vmul.f32 1.442695, %v428_v19 }
 0x270   : > { %829 = vpow2.f32 %v429_v20 }
 0x271   : > { %831 = vpow2.f32 %v421_v23 }
 0x27a   : > { %v830_v21 = vpop.eup %829 }
 0x27b   : > { %733 = vmatmul.mubr.msk.f32.vlgmr.msra.gmra.mrb[0].mxu1 %vm315_vm0, %v830_v21  ;;  %v433_v22 = vsel %vm315_vm0, %v830_v21, 0.0  ;;  %v832_v24 = vpop.eup %831 }
 0x27c   : > { %434 = vadd.xlane.f32.xlu1 %v433_v22  ;;  %v432_v26 = vmul.f32 %v832_v24, %v431_v25 }
 0x28d   : > { %442 = vperm.xlu1 %828, %v832_v24  }
 0x309   : > { %v435_v27 = vpop.xlane.xlu1 %434 }
 0x30a   : > { %v436_v28 = vadd.f32 %v435_v27, %v432_v26 }
 0x30c   : > { %438 = vst.msk [vmem:[#allocation3] sm:$0xff] %vm312_vm2, %v436_v28 }
 0x30d   : > { %v443_v32 = vpop.permute.xlu1 %442 }
 0x30e   : > { %v445_v33 = vmul.f32 %v443_v32, %v439_v31 }
 0x313   : > { %v525_v29 = vld [vmem:[#allocation3] sm:$0xff] }
 0x314   : > { %833 = vrcp.f32 %v525_v29 }
 0x31e   : > { %v834_v30 = vpop.eup %833 }
 0x31f   : > { %530 = vperm.xlu1 %828, %v834_v30  }
 0x34e   : > { %v515_v34 = vpop.f32.mrb[0].mxu1 }
 0x34f   : > { %v519_v35 = vadd.f32 %v515_v34, %v445_v33  ;;  %v734_v36 = vpop.f32.mrb[1].mxu1 }
 0x351   : > { %520 = vst.msk [vmem:[#allocation4] sm:$0xff] %vm315_vm0, %v519_v35 }
 0x358   : > { %v527_v37 = vld [vmem:[#allocation4] sm:$0xff] }
 0x39e   : > { %v531_v38 = vpop.permute.xlu1 %530 }
 0x39f   : > { %v533_v39 = vmul.f32 %v531_v38, %v527_v37 }
 0x3a1   : > { %535 = vst.msk [vmem:[%s307_s26] sm:$0xff] %vm315_vm0, %v533_v39 }
 0x3a2   : > { %938 = shalt.err (!%p935_p13)
}
 0x3a3   : > { %s939_s21 = scalar_lea.hbm %s1300_s1, 128  ;;  %s943_s24 = scalar_lea.hbm %s1358_s3, 1024 }
 0x3a4   : > { %p940_p12 = scmp.ne.s32.totalorder %s1300_s1, %s939_s21  ;;  %p944_p7 = scmp.lt.u32.totalorder %s1300_s1, %s1358_s3 }
 0x3a5   : > { %p945_p3 = scmp.lt.u32.totalorder %s943_s24, %s939_s21  ;;  %p947_p4 = scmp.lt.u32.totalorder %s939_s21, %s1300_s1 }
 0x3a6   : > { %p941_p6 = pnand %p940_p12, %p1389_p10 }
 0x3a7   : > { %p946_p0 = por %p945_p3, %p944_p7 }
 0x3a8   : > { %p942_p5 = pneg %p941_p6 }
 0x3a9   : > { %p948_p1 = por %p947_p4, %p946_p0 }
 0x3ab   : > { %p949_p2 = pnand %p948_p1, %p942_p5 }
 0x3ad   : > { %952 = shalt.err (!%p949_p2)
}
 0x3ae   : > { %741 = dma.vmem_to_hbm [thread:$0]  (%p1389_p10), %s1302_s9, 128, %s1300_s1, %s537_s16  }
 0x3af PF: > { %s1390_s10 = sld [smem:[#allocation19_spill]]  ;;  %p758_p8 = scmp.ge.s32.totalorder %s1027_s19, 2 }
 0x3b0   : > { %s565_s8 = sand.u32 1, %s999_s12  }
 0x3b1   : > { %s566_s23 = scalar_lea.sflag [#allocation7], %s565_s8 }
 0x3b5   : > { %p1391_p9 = scmp.ne.s32.totalorder %s1390_s10, 0 }
 0x3b7   : > { %p754_p11 = pnand %p758_p8, %p1391_p9 }
 0x3b9   : > { %994 = dma.done.wait (!%p754_p11), %s566_s23, 128  }
 0x3ba   : > { %996 = vsyncadd (!%p754_p11), %s566_s23, 4294967168  ;;  %s22_s19 = sadd.s32 1, %s1027_s19   ;;  %s1392_s28 = sld [smem:[#allocation20_spill]] }
 0x3bb   : > { %p19_p13 = scmp.ge.s32.totalorder %s22_s19, 10   ;;  %s1393_s15 = sld [smem:[#allocation15_spill]] }
 0x3bc   : > { %s1394_s16 = sld [smem:[#allocation16_spill]]  ;;  %s1395_s17 = sld [smem:[#allocation17_spill]] }
 0x3bd   : > { %s1396_s18 = sld [smem:[#allocation18_spill]]  ;;  %s1397_s12 = smov %s1003_s13 }
 0x3be   : > { %s1398_s13 = smov %s1007_s14  ;;  %21 = sbr.rel (!%p19_p13) target bundleno = 11 (0xb), region = 113 }
 0x3c0   : > { %s1399_s14 = smov %s1392_s28 }
 0x3c5   :  { %571 = vsyncpa [#allocation6], 1 }
 0x3c6   :  { %573 = vsyncpa [#allocation6 + $0x1], 1 }
 0x3c7   :  { %574 = vsyncpa [#allocation9], 1 }
 0x3c8   :  { %576 = vsyncpa [#allocation9 + $0x1], 1 }
 0x3c9   :  { %577 = vsyncpa [#allocation7], 1 }
 0x3ca   :  { %579 = vsyncpa [#allocation7 + $0x1], 1 }

</bundles_post_ra>
